<compile_context>
chip_gen: v7x
topology: tpu7x:2x2x1
jax: 0.10.0
libtpu: 0.0.40
codegen_flags: <defaults>
</compile_context>

<pallas_src>
import math

import jax
import jax.numpy as jnp
from jax.experimental import pallas as pl
from jax.experimental.pallas import tpu as pltpu


def make_kernel(res_channels: int, skip_channels: int, dilation: int,
                tile_l: int, halo: int, mxu_dtype):
    C = res_channels
    S = skip_channels
    d = dilation
    TL = tile_l
    H = halo
    SQRT_HALF = float(math.sqrt(0.5))   # python float: no captured jnp constant

    def kernel(x_ref, xl_ref, xr_ref, e_ref,
               w_dil_ref, b_dil_ref, w_rs_ref, b_rs_ref,
               y_ref, skip_ref):
        # x_ref:  (C, TL)  centre tile of x
        # xl_ref: (C, H)   x columns [j*TL - H, j*TL)   (clamped block at j == 0)
        # xr_ref: (C, H)   x columns [(j+1)*TL, +H)     (clamped block at last j)
        # e_ref:  (C, 1)   diffusion-step embedding (already Linear'd)
        j = pl.program_id(1)
        nj = pl.num_programs(1)

        e = e_ref[...].astype(jnp.float32)                               # (C, 1)

        # h = x + e inside [0, L); conv zero padding outside -> boundary tiles
        # replace the (clamped, meaningless) halo block with zeros.
        centre = x_ref[...].astype(jnp.float32) + e                      # (C, TL)
        left = jnp.where(j > 0, xl_ref[...].astype(jnp.float32) + e, 0.0)       # (C, H)
        right = jnp.where(j < nj - 1, xr_ref[...].astype(jnp.float32) + e, 0.0)  # (C, H)
        slab = jnp.concatenate([left, centre, right], axis=-1)           # (C, TL+2H) f32

        # Fused 3-tap dilated conv: stack the three shifted taps along the
        # sublane (channel) axis -> one (2C, 3C) x (3C, TL) bf16 MXU matmul
        # with f32 accumulation.
        taps = jnp.concatenate(
            [slab[:, H - d + k * d: H - d + k * d + TL].astype(mxu_dtype)
             for k in range(3)],
            axis=0)                                                      # (3C, TL)
        hd = jnp.dot(w_dil_ref[...], taps,
                     preferred_element_type=jnp.float32) + b_dil_ref[...]

        # Gated activation: sigmoid on the second C channels, tanh on the first.
        # sigmoid(g) == 0.5*(1 + tanh(g/2)): both gates use the EUP tanh path.
        gate = hd[C:, :]
        filt = hd[:C, :]
        out = (0.5 + 0.5 * jnp.tanh(0.5 * gate)) * jnp.tanh(filt)        # (C, TL) f32

        # Fused res + skip 1x1 convs: one ((C+S), C) x (C, TL) bf16 matmul.
        rs = jnp.dot(w_rs_ref[...], out.astype(mxu_dtype),
                     preferred_element_type=jnp.float32) + b_rs_ref[...]
        res = rs[:C, :]
        sk = rs[C:, :]

        # Re-read x from its VMEM input buffer only now (short live range).
        y_ref[...] = ((x_ref[...].astype(jnp.float32) + res) * SQRT_HALF
                      ).astype(y_ref.dtype)
        skip_ref[...] = sk.astype(skip_ref.dtype)

    return kernel


def residual_block(x, emb, params, *, dilation: int, tile_l: int = 4096,
                   mxu_dtype=jnp.bfloat16, vmem_limit_bytes=None):
    """x: (B, C, L) (f32 or bf16), emb: (B, E), params: dict of f32 weights.

    Outputs (y, skip) in x.dtype.  Pass bf16 x for a bf16 HBM boundary.
    """
    B, C, L = x.shape
    S = params["w_skip"].shape[0]
    d = int(dilation)

    TL = min(tile_l, L)
    assert TL % 128 == 0 and L % TL == 0, \
        "L must be a multiple of the (128-aligned) length tile"
    NJ = L // TL
    # Halo block width rounded up to a lane multiple; halo blocks are read
    # directly from x via clamped index_maps (no wrapper-built halo array).
    H = ((d + 127) // 128) * 128
    assert d <= H <= TL and TL % H == 0, \
        "length tile must be a multiple of the 128-aligned halo width"
    R = TL // H          # halo blocks per length tile
    NH = L // H          # total halo blocks along L

    # --- hoisted diffusion-step embedding Linear (trivial FLOPs, N=1 matmul) ---
    e = emb.astype(jnp.float32) @ params["w_emb"].T.astype(jnp.float32) \
        + params["b_emb"].astype(jnp.float32)                     # (B, C)
    e = e[:, :, None]                                             # (B, C, 1)

    # --- fused weights, cast to the MXU operand dtype (accumulation stays f32) ---
    # dilated conv (2C, C, 3) -> (2C, 3C) with tap index major on K
    w_dil = jnp.transpose(params["w_dil"], (0, 2, 1)).reshape(2 * C, 3 * C) \
        .astype(mxu_dtype)
    b_dil = params["b_dil"].reshape(2 * C, 1).astype(jnp.float32)
    # res + skip 1x1 convs fused into a single ((C+S), C) weight
    w_rs = jnp.concatenate([params["w_res"], params["w_skip"]], axis=0) \
        .astype(mxu_dtype)                                        # (C+S, C)
    b_rs = jnp.concatenate([params["b_res"], params["b_skip"]]) \
        .reshape(C + S, 1).astype(jnp.float32)

    kernel = make_kernel(C, S, d, TL, H, mxu_dtype)

    # --- right-sized VMEM limit (cap at 64 MiB so it also fits v7x) ---
    if vmem_limit_bytes is None:
        io = x.dtype.itemsize
        mb = jnp.dtype(mxu_dtype).itemsize
        est = (2 * (C * TL + 2 * C * H + C) * io          # double-buffered inputs
               + 2 * (C + S) * TL * io                    # double-buffered outputs
               + C * (TL + 2 * H) * 4                     # slab (f32)
               + 3 * C * TL * mb                          # taps (mxu dtype)
               + (2 * C + C + (C + S) + C) * TL * 4       # hd / out / rs / y temps
               + (6 * C * C + (C + S) * C) * mb + (3 * C + S) * 4)   # weights
        vmem_limit_bytes = max(16 << 20, min(2 * est, 64 << 20))

    def bcast(*shape):
        n = len(shape)
        return pl.BlockSpec(shape, lambda b, j, n=n: (0,) * n)

    grid_spec = pltpu.PrefetchScalarGridSpec(
        num_scalar_prefetch=0,
        grid=(B, NJ),
        in_specs=[
            # centre tile of x
            pl.BlockSpec((None, C, TL), lambda b, j: (b, 0, j)),
            # left halo: the H-wide block of x just left of the tile (clamped at j=0)
            pl.BlockSpec((None, C, H),
                         lambda b, j: (b, 0, jnp.maximum(j * R - 1, 0))),
            # right halo: the H-wide block of x just right of the tile (clamped at last j)
            pl.BlockSpec((None, C, H),
                         lambda b, j: (b, 0, jnp.minimum(j * R + R, NH - 1))),
            pl.BlockSpec((None, C, 1), lambda b, j: (b, 0, 0)),           # e
            bcast(2 * C, 3 * C),                                          # w_dil
            bcast(2 * C, 1),                                              # b_dil
            bcast(C + S, C),                                              # w_rs
            bcast(C + S, 1),                                              # b_rs
        ],
        out_specs=(
            pl.BlockSpec((None, C, TL), lambda b, j: (b, 0, j)),          # residual out
            pl.BlockSpec((None, S, TL), lambda b, j: (b, 0, j)),          # skip out
        ),
    )

    return pl.pallas_call(
        kernel,
        out_shape=(jax.ShapeDtypeStruct((B, C, L), x.dtype),
                   jax.ShapeDtypeStruct((B, S, L), x.dtype)),
        grid_spec=grid_spec,
        compiler_params=pltpu.CompilerParams(
            dimension_semantics=("parallel", "parallel"),
            vmem_limit_bytes=int(vmem_limit_bytes)),
    )(x, x, x, e, w_dil, b_dil, w_rs, b_rs)


def residual_block_ref(x, emb, params, *, dilation: int):
    """Pure-JAX reference matching the PyTorch forward."""
    B, C, L = x.shape
    e = emb @ params["w_emb"].T + params["b_emb"]                 # (B, C)
    h = x + e[:, :, None]
    hp = jnp.pad(h, ((0, 0), (0, 0), (dilation, dilation)))
    hd = jnp.zeros((B, 2 * C, L), jnp.float32)
    for k in range(3):
        tap = hp[:, :, k * dilation:k * dilation + L]
        hd = hd + jnp.einsum("oc,bcl->bol", params["w_dil"][:, :, k], tap)
    hd = hd + params["b_dil"][None, :, None]
    gate, filt = hd[:, C:, :], hd[:, :C, :]
    out = jax.nn.sigmoid(gate) * jnp.tanh(filt)
    res = jnp.einsum("oc,bcl->bol", params["w_res"], out) + params["b_res"][None, :, None]
    skip = jnp.einsum("oc,bcl->bol", params["w_skip"], out) + params["b_skip"][None, :, None]
    return (x + res) * math.sqrt(0.5), skip


if __name__ == "__main__":
    B = 2
    res_channels = 32
    skip_channels = 32
    L = 768                 # 3 length-tiles of 256 -> exercises both boundaries + interior
    embed_dim = 64          # diffusion_step_embed_dim_out (small synthetic size)
    dilation = 4
    tile_l = 256

    key = jax.random.PRNGKey(0)
    ks = jax.random.split(key, 10)

    C, S, E = res_channels, skip_channels, embed_dim
    scale = 0.1
    params = {
        "w_emb":  scale * jax.random.normal(ks[0], (C, E), jnp.float32),
        "b_emb":  scale * jax.random.normal(ks[1], (C,), jnp.float32),
        "w_dil":  scale * jax.random.normal(ks[2], (2 * C, C, 3), jnp.float32),
        "b_dil":  scale * jax.random.normal(ks[3], (2 * C,), jnp.float32),
        "w_res":  scale * jax.random.normal(ks[4], (C, C), jnp.float32),
        "b_res":  scale * jax.random.normal(ks[5], (C,), jnp.float32),
        "w_skip": scale * jax.random.normal(ks[6], (S, C), jnp.float32),
        "b_skip": scale * jax.random.normal(ks[7], (S,), jnp.float32),
    }

    x = jax.random.normal(ks[8], (B, C, L), jnp.float32)
    emb = jax.random.normal(ks[9], (B, E), jnp.float32)

    y_ref, skip_ref = residual_block_ref(x, emb, params, dilation=dilation)

    # f32 HBM boundary, bf16 MXU operands (f32 accumulation).
    y, skip = residual_block(x, emb, params, dilation=dilation, tile_l=tile_l)
    y = jax.block_until_ready(y)
    skip = jax.block_until_ready(skip)
    # bf16 matmul operands: looser tolerance than f32 MXU; layout bugs would be ~1.
    assert jnp.allclose(y, y_ref, atol=3e-2, rtol=3e-2)
    assert jnp.allclose(skip, skip_ref, atol=3e-2, rtol=3e-2)

    # bf16 HBM boundary (halves x/y/skip HBM bytes on the bandwidth-bound path).
    yb, skipb = residual_block(x.astype(jnp.bfloat16), emb, params,
                               dilation=dilation, tile_l=tile_l)
    yb = jax.block_until_ready(yb)
    skipb = jax.block_until_ready(skipb)
    assert yb.dtype == jnp.bfloat16 and skipb.dtype == jnp.bfloat16
    assert jnp.allclose(yb.astype(jnp.float32), y_ref, atol=7e-2, rtol=7e-2)
    assert jnp.allclose(skipb.astype(jnp.float32), skip_ref, atol=7e-2, rtol=7e-2)

    print("KERNEL_OK")
</pallas_src>

<mosaic_0001>
module attributes {stable_mosaic.version = 11 : i64} {
  func.func @kernel(%arg0: i32, %arg1: i32, %arg2: memref<1x32x256xf32, #tpu.memory_space<vmem>>, %arg3: memref<1x32x128xf32, #tpu.memory_space<vmem>>, %arg4: memref<1x32x128xf32, #tpu.memory_space<vmem>>, %arg5: memref<1x32x1xf32, #tpu.memory_space<vmem>>, %arg6: memref<64x96xbf16, #tpu.memory_space<vmem>>, %arg7: memref<64x1xf32, #tpu.memory_space<vmem>>, %arg8: memref<64x32xbf16, #tpu.memory_space<vmem>>, %arg9: memref<64x1xf32, #tpu.memory_space<vmem>>, %arg10: memref<1x32x256xf32, #tpu.memory_space<vmem>>, %arg11: memref<1x32x256xf32, #tpu.memory_space<vmem>>) attributes {dimension_semantics = [#tpu.dimension_semantics<parallel>, #tpu.dimension_semantics<parallel>], iteration_bounds = array<i64: 2, 3>, scalar_prefetch = 0 : i64, scratch_operands = 0 : i64, tpu.core_type = #tpu.core_type<tc>, window_params = [{transform_indices = @transform_0, window_bounds = array<i64: 1, 32, 256>}, {transform_indices = @transform_1, window_bounds = array<i64: 1, 32, 128>}, {transform_indices = @transform_2, window_bounds = array<i64: 1, 32, 128>}, {transform_indices = @transform_3, window_bounds = array<i64: 1, 32, 1>}, {pipeline_mode = #tpu.pipeline_mode<synchronous>, transform_indices = @transform_4, window_bounds = array<i64: 64, 96>}, {pipeline_mode = #tpu.pipeline_mode<synchronous>, transform_indices = @transform_5, window_bounds = array<i64: 64, 1>}, {pipeline_mode = #tpu.pipeline_mode<synchronous>, transform_indices = @transform_6, window_bounds = array<i64: 64, 32>}, {pipeline_mode = #tpu.pipeline_mode<synchronous>, transform_indices = @transform_7, window_bounds = array<i64: 64, 1>}, {transform_indices = @transform_8, window_bounds = array<i64: 1, 32, 256>}, {transform_indices = @transform_9, window_bounds = array<i64: 1, 32, 256>}]} {
    %c0 = arith.constant 0 : index
    %c0_0 = arith.constant 0 : index
    %c0_1 = arith.constant 0 : index
    %0 = vector.load %arg5[%c0, %c0_0, %c0_1] : memref<1x32x1xf32, #tpu.memory_space<vmem>>, vector<1x32x1xf32>
    %1 = vector.shape_cast %0 : vector<1x32x1xf32> to vector<32x1xf32>
    %c0_2 = arith.constant 0 : index
    %c0_3 = arith.constant 0 : index
    %c0_4 = arith.constant 0 : index
    %2 = vector.load %arg2[%c0_2, %c0_3, %c0_4] : memref<1x32x256xf32, #tpu.memory_space<vmem>>, vector<1x32x256xf32>
    %3 = vector.shape_cast %2 : vector<1x32x256xf32> to vector<32x256xf32>
    %4 = vector.broadcast %1 : vector<32x1xf32> to vector<32x256xf32>
    %5 = arith.addf %3, %4 : vector<32x256xf32>
    %c0_i32 = arith.constant 0 : i32
    %6 = arith.cmpi sgt, %arg1, %c0_i32 : i32
    %c0_5 = arith.constant 0 : index
    %c0_6 = arith.constant 0 : index
    %c0_7 = arith.constant 0 : index
    %7 = vector.load %arg3[%c0_5, %c0_6, %c0_7] : memref<1x32x128xf32, #tpu.memory_space<vmem>>, vector<1x32x128xf32>
    %8 = vector.shape_cast %7 : vector<1x32x128xf32> to vector<32x128xf32>
    %9 = vector.broadcast %1 : vector<32x1xf32> to vector<32x128xf32>
    %10 = arith.addf %8, %9 : vector<32x128xf32>
    %cst = arith.constant 0.000000e+00 : f32
    %11 = vector.broadcast %cst : f32 to vector<32x128xf32>
    %12 = arith.select %6, %10, %11 : vector<32x128xf32>
    %c2_i32 = arith.constant 2 : i32
    %13 = arith.cmpi slt, %arg1, %c2_i32 : i32
    %c0_8 = arith.constant 0 : index
    %c0_9 = arith.constant 0 : index
    %c0_10 = arith.constant 0 : index
    %14 = vector.load %arg4[%c0_8, %c0_9, %c0_10] : memref<1x32x128xf32, #tpu.memory_space<vmem>>, vector<1x32x128xf32>
    %15 = vector.shape_cast %14 : vector<1x32x128xf32> to vector<32x128xf32>
    %16 = vector.broadcast %1 : vector<32x1xf32> to vector<32x128xf32>
    %17 = arith.addf %15, %16 : vector<32x128xf32>
    %cst_11 = arith.constant 0.000000e+00 : f32
    %18 = vector.broadcast %cst_11 : f32 to vector<32x128xf32>
    %19 = arith.select %13, %17, %18 : vector<32x128xf32>
    %20 = tpu.concatenate %12, %5, %19 in 1 : vector<32x128xf32>, vector<32x256xf32>, vector<32x128xf32> -> vector<32x512xf32>
    %21 = vector.extract_strided_slice %20 {offsets = [0, 124], sizes = [32, 256], strides = [1, 1]} : vector<32x512xf32> to vector<32x256xf32>
    %22 = arith.truncf %21 : vector<32x256xf32> to vector<32x256xbf16>
    %23 = vector.extract_strided_slice %20 {offsets = [0, 128], sizes = [32, 256], strides = [1, 1]} : vector<32x512xf32> to vector<32x256xf32>
    %24 = arith.truncf %23 : vector<32x256xf32> to vector<32x256xbf16>
    %25 = vector.extract_strided_slice %20 {offsets = [0, 132], sizes = [32, 256], strides = [1, 1]} : vector<32x512xf32> to vector<32x256xf32>
    %26 = arith.truncf %25 : vector<32x256xf32> to vector<32x256xbf16>
    %27 = tpu.concatenate %22, %24, %26 in 0 : vector<32x256xbf16>, vector<32x256xbf16>, vector<32x256xbf16> -> vector<96x256xbf16>
    %c0_12 = arith.constant 0 : index
    %c0_13 = arith.constant 0 : index
    %28 = vector.load %arg6[%c0_12, %c0_13] : memref<64x96xbf16, #tpu.memory_space<vmem>>, vector<64x96xbf16>
    %cst_14 = arith.constant dense<0.000000e+00> : vector<64x256xf32>
    %29 = tpu.matmul %28, %27, %cst_14 {dimension_numbers = #tpu.dot_dimension_numbers<[1], [0], [0], [1], [0, 0, 1, 1], [], []>} : vector<64x96xbf16>, vector<96x256xbf16>, vector<64x256xf32> -> vector<64x256xf32>
    %c0_15 = arith.constant 0 : index
    %c0_16 = arith.constant 0 : index
    %30 = vector.load %arg7[%c0_15, %c0_16] : memref<64x1xf32, #tpu.memory_space<vmem>>, vector<64x1xf32>
    %31 = vector.broadcast %30 : vector<64x1xf32> to vector<64x256xf32>
    %32 = arith.addf %29, %31 : vector<64x256xf32>
    %33 = vector.extract_strided_slice %32 {offsets = [32, 0], sizes = [32, 256], strides = [1, 1]} : vector<64x256xf32> to vector<32x256xf32>
    %34 = vector.extract_strided_slice %32 {offsets = [0, 0], sizes = [32, 256], strides = [1, 1]} : vector<64x256xf32> to vector<32x256xf32>
    %cst_17 = arith.constant 5.000000e-01 : f32
    %35 = vector.broadcast %cst_17 : f32 to vector<32x256xf32>
    %36 = arith.mulf %35, %33 : vector<32x256xf32>
    %37 = math.tanh %36 : vector<32x256xf32>
    %cst_18 = arith.constant 5.000000e-01 : f32
    %38 = vector.broadcast %cst_18 : f32 to vector<32x256xf32>
    %39 = arith.mulf %38, %37 : vector<32x256xf32>
    %cst_19 = arith.constant 5.000000e-01 : f32
    %40 = vector.broadcast %cst_19 : f32 to vector<32x256xf32>
    %41 = arith.addf %40, %39 : vector<32x256xf32>
    %42 = math.tanh %34 : vector<32x256xf32>
    %43 = arith.mulf %41, %42 : vector<32x256xf32>
    %c0_20 = arith.constant 0 : index
    %c0_21 = arith.constant 0 : index
    %44 = vector.load %arg8[%c0_20, %c0_21] : memref<64x32xbf16, #tpu.memory_space<vmem>>, vector<64x32xbf16>
    %45 = arith.truncf %43 : vector<32x256xf32> to vector<32x256xbf16>
    %cst_22 = arith.constant dense<0.000000e+00> : vector<64x256xf32>
    %46 = tpu.matmul %44, %45, %cst_22 {dimension_numbers = #tpu.dot_dimension_numbers<[1], [0], [0], [1], [0, 0, 1, 1], [], []>} : vector<64x32xbf16>, vector<32x256xbf16>, vector<64x256xf32> -> vector<64x256xf32>
    %c0_23 = arith.constant 0 : index
    %c0_24 = arith.constant 0 : index
    %47 = vector.load %arg9[%c0_23, %c0_24] : memref<64x1xf32, #tpu.memory_space<vmem>>, vector<64x1xf32>
    %48 = vector.broadcast %47 : vector<64x1xf32> to vector<64x256xf32>
    %49 = arith.addf %46, %48 : vector<64x256xf32>
    %50 = vector.extract_strided_slice %49 {offsets = [0, 0], sizes = [32, 256], strides = [1, 1]} : vector<64x256xf32> to vector<32x256xf32>
    %51 = vector.extract_strided_slice %49 {offsets = [32, 0], sizes = [32, 256], strides = [1, 1]} : vector<64x256xf32> to vector<32x256xf32>
    %c0_25 = arith.constant 0 : index
    %c0_26 = arith.constant 0 : index
    %c0_27 = arith.constant 0 : index
    %52 = vector.load %arg2[%c0_25, %c0_26, %c0_27] : memref<1x32x256xf32, #tpu.memory_space<vmem>>, vector<1x32x256xf32>
    %53 = vector.shape_cast %52 : vector<1x32x256xf32> to vector<32x256xf32>
    %54 = arith.addf %53, %50 : vector<32x256xf32>
    %cst_28 = arith.constant 0.707106769 : f32
    %55 = vector.broadcast %cst_28 : f32 to vector<32x256xf32>
    %56 = arith.mulf %54, %55 : vector<32x256xf32>
    %c0_29 = arith.constant 0 : index
    %c0_30 = arith.constant 0 : index
    %c0_31 = arith.constant 0 : index
    %57 = vector.load %arg10[%c0_29, %c0_30, %c0_31] : memref<1x32x256xf32, #tpu.memory_space<vmem>>, vector<1x32x256xf32>
    %58 = vector.shape_cast %57 : vector<1x32x256xf32> to vector<32x256xf32>
    %59 = vector.shape_cast %56 : vector<32x256xf32> to vector<1x32x256xf32>
    tpu.vector_store %arg10[%c0_29, %c0_30, %c0_31], %59 {strides = array<i32>} : memref<1x32x256xf32, #tpu.memory_space<vmem>>, vector<1x32x256xf32>,
    %c0_32 = arith.constant 0 : index
    %c0_33 = arith.constant 0 : index
    %c0_34 = arith.constant 0 : index
    %60 = vector.load %arg11[%c0_32, %c0_33, %c0_34] : memref<1x32x256xf32, #tpu.memory_space<vmem>>, vector<1x32x256xf32>
    %61 = vector.shape_cast %60 : vector<1x32x256xf32> to vector<32x256xf32>
    %62 = vector.shape_cast %51 : vector<32x256xf32> to vector<1x32x256xf32>
    tpu.vector_store %arg11[%c0_32, %c0_33, %c0_34], %62 {strides = array<i32>} : memref<1x32x256xf32, #tpu.memory_space<vmem>>, vector<1x32x256xf32>,
    return
  }
  func.func @transform_0(%arg0: i32, %arg1: i32) -> (i32, i32, i32) {
    %c0_i32 = arith.constant 0 : i32
    %c0_i32_0 = arith.constant 0 : i32
    return %arg0, %c0_i32, %arg1 : i32, i32, i32
  }
  func.func @transform_1(%arg0: i32, %arg1: i32) -> (i32, i32, i32) {
    %c2_i32 = arith.constant 2 : i32
    %0 = arith.muli %arg1, %c2_i32 : i32
    %c1_i32 = arith.constant 1 : i32
    %1 = arith.subi %0, %c1_i32 : i32
    %c0_i32 = arith.constant 0 : i32
    %2 = arith.maxsi %1, %c0_i32 : i32
    %c0_i32_0 = arith.constant 0 : i32
    %c0_i32_1 = arith.constant 0 : i32
    return %arg0, %c0_i32_0, %2 : i32, i32, i32
  }
  func.func @transform_2(%arg0: i32, %arg1: i32) -> (i32, i32, i32) {
    %c2_i32 = arith.constant 2 : i32
    %0 = arith.muli %arg1, %c2_i32 : i32
    %c2_i32_0 = arith.constant 2 : i32
    %1 = arith.addi %0, %c2_i32_0 : i32
    %c5_i32 = arith.constant 5 : i32
    %2 = arith.minsi %1, %c5_i32 : i32
    %c0_i32 = arith.constant 0 : i32
    %c0_i32_1 = arith.constant 0 : i32
    return %arg0, %c0_i32, %2 : i32, i32, i32
  }
  func.func @transform_3(%arg0: i32, %arg1: i32) -> (i32, i32, i32) {
    %c0_i32 = arith.constant 0 : i32
    %c0_i32_0 = arith.constant 0 : i32
    %c0_i32_1 = arith.constant 0 : i32
    return %arg0, %c0_i32, %c0_i32_0 : i32, i32, i32
  }
  func.func @transform_4(%arg0: i32, %arg1: i32) -> (i32, i32) {
    %c0_i32 = arith.constant 0 : i32
    %c0_i32_0 = arith.constant 0 : i32
    %c0_i32_1 = arith.constant 0 : i32
    return %c0_i32, %c0_i32_0 : i32, i32
  }
  func.func @transform_5(%arg0: i32, %arg1: i32) -> (i32, i32) {
    %c0_i32 = arith.constant 0 : i32
    %c0_i32_0 = arith.constant 0 : i32
    %c0_i32_1 = arith.constant 0 : i32
    return %c0_i32, %c0_i32_0 : i32, i32
  }
  func.func @transform_6(%arg0: i32, %arg1: i32) -> (i32, i32) {
    %c0_i32 = arith.constant 0 : i32
    %c0_i32_0 = arith.constant 0 : i32
    %c0_i32_1 = arith.constant 0 : i32
    return %c0_i32, %c0_i32_0 : i32, i32
  }
  func.func @transform_7(%arg0: i32, %arg1: i32) -> (i32, i32) {
    %c0_i32 = arith.constant 0 : i32
    %c0_i32_0 = arith.constant 0 : i32
    %c0_i32_1 = arith.constant 0 : i32
    return %c0_i32, %c0_i32_0 : i32, i32
  }
  func.func @transform_8(%arg0: i32, %arg1: i32) -> (i32, i32, i32) {
    %c0_i32 = arith.constant 0 : i32
    %c0_i32_0 = arith.constant 0 : i32
    return %arg0, %c0_i32, %arg1 : i32, i32, i32
  }
  func.func @transform_9(%arg0: i32, %arg1: i32) -> (i32, i32, i32) {
    %c0_i32 = arith.constant 0 : i32
    %c0_i32_0 = arith.constant 0 : i32
    return %arg0, %c0_i32, %arg1 : i32, i32, i32
  }
}

</mosaic_0001>

<bundles_post_ra>
// kernel: tpu_custom_call.1
= control target key start
LH: loop header
LB: loop body
LE: loop exit
PB: predicated region body
PF: predicated region fallthrough
CT: control target
= control target key end

     0   :  { %s2604_s0 = inlined_call_operand.hbm [shape: f32[2,32,768], index: 0, kind: input, shape index: {}]   ;;  %s2605_s1 = inlined_call_operand.hbm [shape: f32[2,32,768], index: 1, kind: input, shape index: {}]   ;;  %s2606_s2 = inlined_call_operand.hbm [shape: f32[2,32,768], index: 2, kind: input, shape index: {}]   ;;  %s2607_s3 = inlined_call_operand.vmem [shape: f32[2,32,1], index: 3, kind: input, shape index: {}]   ;;  %s2608_s4 = inlined_call_operand.vmem [shape: bf16[64,96], index: 4, kind: input, shape index: {}]   ;;  %s2609_s5 = inlined_call_operand.vmem [shape: f32[64,1], index: 5, kind: input, shape index: {}]   ;;  %s2610_s6 = inlined_call_operand.vmem [shape: bf16[64,32], index: 6, kind: input, shape index: {}]   ;;  %s2611_s7 = inlined_call_operand.vmem [shape: f32[64,1], index: 7, kind: input, shape index: {}]   ;;  %s2612_s8 = inlined_call_operand.hbm [shape: f32[2,32,768], index: 8, kind: output, shape index: {0}]   ;;  %s2613_s9 = inlined_call_operand.hbm [shape: f32[2,32,768], index: 9, kind: output, shape index: {1}]  }
   0x1   :  { %2641 = sst [smem:[#allocation26_spill]] %s2604_s0 }
   0x2   :  { %2642 = sst [smem:[#allocation27_spill]] %s2605_s1 }
   0x3   :  { %2643 = sst [smem:[#allocation28_spill]] %s2607_s3 }
   0x4   :  { %2644 = sst [smem:[#allocation29_spill]] %s2608_s4 }
   0x5   :  { %2645 = sst [smem:[#allocation30_spill]] %s2609_s5 }
   0x6   :  { %2646 = sst [smem:[#allocation31_spill]] %s2610_s6 }
   0x7   :  { %2647 = sst [smem:[#allocation32_spill]] %s2611_s7 }
   0x8   :  { %2648 = sst [smem:[#allocation33_spill]] %s2612_s8 }
   0x9   :  { %2649 = sst [smem:[#allocation34_spill]] %s2613_s9 }
   0xa   :  { %15 = vsyncpa [#allocation3], 0 }
   0xb   :  { %17 = vsyncpa [#allocation3 + $0x1], 0 }
   0xc   :  { %18 = vsyncpa [#allocation6], 0 }
   0xd   :  { %20 = vsyncpa [#allocation6 + $0x1], 0 }
   0xe   :  { %21 = vsyncpa [#allocation4], 0 }
   0xf   :  { %23 = vsyncpa [#allocation4 + $0x1], 0 }
  0x10   :  { %24 = vsyncpa [#allocation10], 0 }
  0x11   :  { %26 = vsyncpa [#allocation10 + $0x1], 0  ;;  %s1927_s30 = smov 0   ;;  %s1929_s10 = smov 0  }
  0x12   :  { %s1931_s11 = smov 0   ;;  %s1933_s12 = smov 0  }
  0x13   :  { %s1935_s13 = smov 0   ;;  %s1937_s14 = smov 0  }
  0x14   :  { %s1939_s15 = smov 0   ;;  %s1941_s16 = smov 0  }
  0x15   :  { %s1943_s17 = smov 0   ;;  %s1945_s18 = smov 0  }
  0x16   :  { %s1947_s19 = smov 0   ;;  %s1949_s20 = smov 0  }
  0x17   :  { %s1951_s21 = smov 0   ;;  %s1953_s22 = smov 0  }
  0x18 LB: > { %2650 = sst [smem:[#allocation16_spill]] %s1822_s13  ;;  %s1998_s23 = sadd.s32 4294967295, %s1858_s22   ;;  %s1858_s22 = sphi %s1953_s22, %s32_s22   ;;  %s1854_s21 = sphi %s1951_s21, %s2712_s21   ;;  %s1850_s20 = sphi %s1949_s20, %s2721_s20   ;;  %s1846_s19 = sphi %s1947_s19, %s2720_s19   ;;  %s1842_s18 = sphi %s1945_s18, %s2709_s18   ;;  %s1838_s17 = sphi %s1943_s17, %s2708_s17   ;;  %s1834_s16 = sphi %s1941_s16, %s2719_s16   ;;  %s1830_s15 = sphi %s1939_s15, %s2718_s15   ;;  %s1826_s14 = sphi %s1937_s14, %s2717_s14   ;;  %s1822_s13 = sphi %s1935_s13, %s2716_s13   ;;  %s1818_s12 = sphi %s1933_s12, %s2705_s12   ;;  %s1814_s11 = sphi %s1931_s11, %s2715_s11   ;;  %s1810_s10 = sphi %s1929_s10, %s2714_s10   ;;  %s1806_s30 = sphi %s1927_s30, %s2713_s30  }
  0x19   : > { %2651 = sst [smem:[#allocation17_spill]] %s1838_s17  ;;  %s41_s24 = sadd.s32 1, %s1850_s20 }
  0x1a   : > { %2652 = sst [smem:[#allocation18_spill]] %s1842_s18  ;;  %p42_p0 = scmp.ge.s32.totalorder %s41_s24, 3 }
  0x1b   : > { %2653 = sst [smem:[#allocation19_spill]] %s1846_s19  ;;  %s44_s25 = sadd.s32 1, %s1854_s21 }
  0x1c   : > { %2654 = sst [smem:[#allocation20_spill]] %s1850_s20  ;;  %p2629_p1 = scmp.eq.s32.totalorder %s1858_s22, 0 }
  0x1d   : > { %2655 = sst [smem:[#allocation21_spill]] %s1854_s21  ;;  %p2628_p2 = scmp.eq.s32.totalorder %s1998_s23, 0 }
  0x1e   : > { %s2723_s24 = smov (%p42_p0, %s41_s24), 0  ;;  %s2725_s25 = smov (!%p42_p0, %s44_s25), %s1854_s21 }
  0x1f   : > { %2656 = sst [smem:[#allocation22_spill]] %s2723_s24  ;;  %s49_s26 = ssub.s32 %s1850_s20, %s2723_s24 }
  0x20   : > { %s2010_s27 = sshll.u32 %s1850_s20, 1  ;;  %p46_p3 = scmp.ge.s32.totalorder %s2725_s25, 2 }
  0x21   : > { %s1332_s28 = sadd.s32 4294967295, %s2010_s27  ;;  %s1333_s29 = sshll.u32 %s2723_s24, 1 }
  0x22   : > { %p78_p4 = scmp.gt.s32.totalorder %s1332_s28, 0  ;;  %s2727_s25 = smov (%p46_p3, %s2725_s25), 0 }
  0x23   : > { %2657 = sst [smem:[#allocation23_spill]] %s2727_s25  ;;  %s2018_s9 = ssub.s32 %s1854_s21, %s2727_s25 }
  0x24   : > { %s2729_s28 = smov (!%p78_p4, %s1332_s28), 0  ;;  %s1334_s8 = sadd.s32 4294967295, %s1333_s29 }
  0x25   : > { %s2021_s20 = sor.u32 %s49_s26, %s2018_s9  ;;  %p82_p5 = scmp.gt.s32.totalorder %s1334_s8, 0 }
  0x26   : > { %s89_s24 = sadd.s32 1, %s1826_s14  ;;  %p96_p7 = scmp.ne.s32.totalorder %s1826_s14, %s1822_s13 }
  0x27   : > { %s2731_s8 = smov (!%p82_p5, %s1334_s8), 0  ;;  %p102_p8 = scmp.ne.s32.totalorder %s1822_s13, %s1818_s12 }
  0x28   : > { %s85_s6 = ssub.s32 %s2729_s28, %s2731_s8  ;;  %s2029_s25 = sadd.s32 2, %s1333_s29 }
  0x29   : > { %s86_s4 = sor.u32 %s85_s6, %s2018_s9  ;;  %p2034_p9 = por %p96_p7, %p2629_p1 }
  0x2a   : > { %p87_p10 = scmp.eq.s32.totalorder %s86_s4, 0  ;;  %p2040_p11 = por %p102_p8, %p2628_p2 }
  0x2b   : > { %p2627_p13 = scmp.lt.s32.totalorder %s1858_s22, 6  ;;  %s2050_s12 = smul.u32 24, %s1854_s21 }
  0x2c   : > { %s2659_s26 = scalar_select %p2040_p11, 1, 0 }
  0x2d   : > { %s2046_s8 = scalar_select %p87_p10, %s1826_s14, %s89_s24  }
  0x2e   : > { %s363_s6 = sand.u32 1, %s1858_s22   ;;  %s365_s29 = sand.u32 1, %s1826_s14  }
  0x2f   : > { %2660 = sst [smem:[#allocation24_spill]] %s2046_s8  ;;  %s1342_s5 = sshll.u32 %s365_s29, 5 }
  0x30   : > { %s376_s18 = sadd.s32 %s2050_s12, %s2729_s28  ;;  %s2661_s1 = sld [smem:[#allocation27_spill]] }
  0x31   : > { %s1345_s3 = sshll.u32 %s376_s18, 7  ;;  %s367_s24 = scalar_lea.vmem [#allocation5], %s1342_s5 }
  0x32   : > { %s379_s8 = sshll.u32 %s367_s24, 4  ;;  %p2066_p0 = pnand %p2627_p13, %p2034_p9  ;;  %s2060_s8 = int_to_ptr.vmem [resolvable:$true] %s379_s8 }
  0x33   : > { %s2071_s18 = scalar_lea.sflag [#allocation6], %s363_s6 }
  0x34   : > { %p1584_p5 = pneg %p2066_p0 }
  0x36   : > { %s2058_s13 = scalar_lea.hbm %s2661_s1, %s1345_s3  ;;  %s1587_s19 = scalar_lea.hbm %s2661_s1, 6144 }
  0x37   : > { %s1582_s3 = scalar_lea.hbm %s2058_s13, 512  ;;  %p1588_p9 = scmp.lt.u32.totalorder %s2058_s13, %s2661_s1 }
  0x38   : > { %p1583_p4 = scmp.ne.s32.totalorder %s2058_s13, %s1582_s3  ;;  %p1589_p10 = scmp.lt.u32.totalorder %s1587_s19, %s1582_s3 }
  0x39   : > { %p1591_p13 = scmp.lt.u32.totalorder %s1582_s3, %s2058_s13 }
  0x3a   : > { %p1585_p7 = pnand %p1584_p5, %p1583_p4  ;;  %p1590_p12 = por %p1589_p10, %p1588_p9 }
  0x3c   : > { %p1586_p8 = pneg %p1585_p7  ;;  %p1592_p2 = por %p1591_p13, %p1590_p12 }
  0x3e   : > { %p1593_p1 = pnand %p1592_p2, %p1586_p8 }
  0x40   : > { %1596 = shalt.err (!%p1593_p1)
}
  0x41   : > { %s1597_s6 = scalar_lea.vmem %s2060_s8, 512  ;;  %s1860_s4 = smov [#allocation5]  }
  0x42   : > { %p1598_p4 = scmp.ne.s32.totalorder %s2060_s8, %s1597_s6  ;;  %s1602_s24 = sshll.u32 %s1860_s4, 4  ;;  %s1603_s24 = int_to_ptr.vmem [resolvable:$false] %s1602_s24 }
  0x43   : > { %s1604_s5 = scalar_lea.vmem %s1603_s24, 1024  ;;  %p1605_p3 = scmp.lt.s32.totalorder %s2060_s8, %s1603_s24 }
  0x44   : > { %p1600_p7 = pnand %p1598_p4, %p1584_p5  ;;  %p1606_p9 = scmp.lt.s32.totalorder %s1604_s5, %s1597_s6 }
  0x46   : > { %p1601_p6 = pneg %p1600_p7  ;;  %p1607_p10 = por %p1606_p9, %p1605_p3 }
  0x48   : > { %p1608_p12 = pnand %p1607_p10, %p1601_p6 }
  0x4a   : > { %1611 = shalt.err (!%p1608_p12)
}
  0x4b   : > { %s2632_s3 = smov 768   ;;  %s2630_s7 = smov 128  }
  0x4c   : > { %s2631_s19 = smov 8   ;;  %p421_p1 = scmp.lt.s32.totalorder %s1858_s22, 7 }
  0x4d   : > { %1403 = dma.hbm_to_vmem [thread:$0]  (!%p2066_p0), %s2058_s13, 512, %s2060_s8, %s2071_s18, %s2632_s3, %s2630_s7, %s2631_s19  }
  0x4e   : > { %p2663_p2 = scmp.ge.s32.totalorder %s1858_s22, 1  ;;  %s1330_s29 = sadd.s32 4294967294, %s1858_s22  }
  0x4f   : > { %s53_s6 = sadd.s32 1, %s1838_s17  ;;  %p2665_p13 = scmp.eq.s32.totalorder %s2021_s20, 0 }
  0x50   : > { %p2105_p6 = pnand %p2663_p2, %p421_p1  ;;  %p60_p3 = scmp.ne.s32.totalorder %s1838_s17, %s1834_s16 }
  0x51   : > { %s2114_s4 = scalar_select %p2665_p13, %s1838_s17, %s53_s6  }
  0x52   : > { %p66_p5 = scmp.ne.s32.totalorder %s1834_s16, %s1830_s15  ;;  %p274_p8 = scmp.eq.s32.totalorder %s1998_s23, 5 }
  0x53   : > { %2666 = sst [smem:[#allocation25_spill]] %s2114_s4  ;;  %p280_p4 = scmp.eq.s32.totalorder %s1330_s29, 5 }
  0x54   : > { %p2667_p7 = scmp.eq.s32.totalorder %s1858_s22, 0  ;;  %p2668_p10 = scmp.eq.s32.totalorder %s1998_s23, 0 }
  0x55   : > { %p2129_p12 = por %p274_p8, %p60_p3  ;;  %p2133_p1 = por %p280_p4, %p66_p5 }
  0x56   : > { %p62_p9 = por %p2667_p7, %p60_p3  ;;  %p2125_p0 = por %p2668_p10, %p66_p5 }
  0x57   : > { %s2670_s21 = scalar_select %p2129_p12, 1, 0 }
  0x58   : > { %s2669_s13 = scalar_select %p2125_p0, 1, 0 }
  0x59   : > { %s2671_s20 = scalar_select %p2133_p1, 1, 0 }
  0x5a   : > { %s340_s8 = sand.u32 1, %s1838_s17   ;;  %s350_s24 = sadd.s32 %s2050_s12, %s2010_s27 }
  0x5b   : > { %s1339_s5 = sshll.u32 %s340_s8, 6  ;;  %s1341_s6 = sshll.u32 %s350_s24, 7 }
  0x5c   : > { %s2672_s0 = sld [smem:[#allocation26_spill]]  ;;  %s344_s3 = scalar_lea.vmem [#allocation2], %s1339_s5 }
  0x5d   : > { %s353_s1 = sshll.u32 %s344_s3, 4  ;;  %p2673_p2 = scmp.lt.s32.totalorder %s1858_s22, 6  ;;  %s2145_s1 = int_to_ptr.vmem [resolvable:$true] %s353_s1 }
  0x5e   : > { %s2153_s24 = scalar_lea.sflag [#allocation3], %s340_s8 }
  0x5f   : > { %p2149_p13 = pnand %p2673_p2, %p62_p9 }
  0x61   : > { %p1614_p5 = pneg %p2149_p13 }
  0x62   : > { %s2143_s19 = scalar_lea.hbm %s2672_s0, %s1341_s6  ;;  %s1617_s6 = scalar_lea.hbm %s2672_s0, 6144 }
  0x63   : > { %s1612_s7 = scalar_lea.hbm %s2143_s19, 1024  ;;  %p1618_p7 = scmp.lt.u32.totalorder %s2143_s19, %s2672_s0 }
  0x64   : > { %p1613_p3 = scmp.ne.s32.totalorder %s2143_s19, %s1612_s7  ;;  %p1619_p9 = scmp.lt.u32.totalorder %s1617_s6, %s1612_s7 }
  0x65   : > { %p1621_p2 = scmp.lt.u32.totalorder %s1612_s7, %s2143_s19 }
  0x66   : > { %p1615_p8 = pnand %p1614_p5, %p1613_p3  ;;  %p1620_p10 = por %p1619_p9, %p1618_p7 }
  0x68   : > { %p1616_p4 = pneg %p1615_p8  ;;  %p1622_p1 = por %p1621_p2, %p1620_p10 }
  0x6a   : > { %p1623_p12 = pnand %p1622_p1, %p1616_p4 }
  0x6c   : > { %1626 = shalt.err (!%p1623_p12)
}
  0x6d   : > { %s1627_s8 = scalar_lea.vmem %s2145_s1, 1024  ;;  %s1864_s3 = smov [#allocation2]  }
  0x6e   : > { %p1628_p3 = scmp.ne.s32.totalorder %s2145_s1, %s1627_s8  ;;  %s1632_s5 = sshll.u32 %s1864_s3, 4  ;;  %s1633_s5 = int_to_ptr.vmem [resolvable:$false] %s1632_s5 }
  0x6f   : > { %s1634_s17 = scalar_lea.vmem %s1633_s5, 2048  ;;  %p1635_p0 = scmp.lt.s32.totalorder %s2145_s1, %s1633_s5 }
  0x70   : > { %p1630_p8 = pnand %p1628_p3, %p1614_p5  ;;  %p1636_p7 = scmp.lt.s32.totalorder %s1634_s17, %s1627_s8 }
  0x72   : > { %p1631_p11 = pneg %p1630_p8  ;;  %p1637_p9 = por %p1636_p7, %p1635_p0 }
  0x74   : > { %p1638_p10 = pnand %p1637_p9, %p1631_p11 }
  0x76   : > { %1641 = shalt.err (!%p1638_p10)
}
  0x77   : > { %s1865_s7 = smov 256   ;;  %s1866_s6 = smov 16  }
  0x78   : > { %s2675_s29 = smov 768   ;;  %s113_s8 = sadd.s32 2, %s2010_s27 }
  0x79   : > { %1400 = dma.hbm_to_vmem [thread:$0]  (!%p2149_p13), %s2143_s19, 1024, %s2145_s1, %s2153_s24, %s2675_s29, %s1865_s7, %s1866_s6  }
  0x7a   : > { %p114_p11 = scmp.lt.s32.totalorder %s113_s8, 5  ;;  %s125_s3 = sadd.s32 1, %s1814_s11 }
  0x7b   : > { %p2676_p0 = scmp.lt.s32.totalorder %s2029_s25, 5  ;;  %p132_p12 = scmp.ne.s32.totalorder %s1814_s11, %s1810_s10 }
  0x7c   : > { %s2735_s8 = smov (!%p114_p11, %s113_s8), 5  ;;  %p138_p1 = scmp.ne.s32.totalorder %s1810_s10, %s1806_s30 }
  0x7d   : > { %s2733_s25 = smov (!%p2676_p0, %s2029_s25), 5  ;;  %s391_s17 = sand.u32 1, %s1814_s11  }
  0x7e   : > { %s121_s5 = ssub.s32 %s2735_s8, %s2733_s25  ;;  %p2677_p5 = scmp.eq.s32.totalorder %s1858_s22, 0 }
  0x7f   : > { %s122_s0 = sor.u32 %s121_s5, %s2018_s9  ;;  %p2678_p3 = scmp.eq.s32.totalorder %s1998_s23, 0 }
  0x80   : > { %p134_p4 = por %p132_p12, %p2677_p5  ;;  %p123_p2 = scmp.eq.s32.totalorder %s122_s0, 0 }
  0x81   : > { %p2197_p8 = por %p138_p1, %p2678_p3  ;;  %s1346_s1 = sshll.u32 %s391_s17, 5 }
  0x82   : > { %s402_s27 = sadd.s32 %s2050_s12, %s2735_s8  ;;  %s393_s0 = scalar_lea.vmem [#allocation7], %s1346_s1 }
  0x83   : > { %s2679_s4 = scalar_select %p2197_p8, 1, 0 }
  0x84   : > { %s2203_s19 = scalar_select %p123_p2, %s1814_s11, %s125_s3  }
  0x85   : > { %s1348_s24 = sshll.u32 %s402_s27, 7  ;;  %s405_s9 = sshll.u32 %s393_s0, 4  ;;  %s2210_s9 = int_to_ptr.vmem [resolvable:$true] %s405_s9 }
  0x86   : > { %s2208_s30 = scalar_lea.hbm %s2606_s2, %s1348_s24  ;;  %p2680_p13 = scmp.lt.s32.totalorder %s1858_s22, 6 }
  0x87   : > { %s1642_s12 = scalar_lea.hbm %s2208_s30, 512  ;;  %s1647_s5 = scalar_lea.hbm %s2606_s2, 6144 }
  0x88   : > { %p2214_p7 = pnand %p2680_p13, %p134_p4  ;;  %p1643_p9 = scmp.ne.s32.totalorder %s2208_s30, %s1642_s12 }
  0x89   : > { %p1648_p12 = scmp.lt.u32.totalorder %s2208_s30, %s2606_s2  ;;  %p1649_p1 = scmp.lt.u32.totalorder %s1647_s5, %s1642_s12 }
  0x8a   : > { %p1644_p10 = pneg %p2214_p7  ;;  %p1651_p4 = scmp.lt.u32.totalorder %s1642_s12, %s2208_s30 }
  0x8b   : > { %p1650_p5 = por %p1649_p1, %p1648_p12 }
  0x8c   : > { %p1645_p11 = pnand %p1644_p10, %p1643_p9 }
  0x8d   : > { %p1652_p2 = por %p1651_p4, %p1650_p5 }
  0x8e   : > { %p1646_p0 = pneg %p1645_p11 }
  0x90   : > { %p1653_p3 = pnand %p1652_p2, %p1646_p0 }
  0x92   : > { %1656 = shalt.err (!%p1653_p3)
}
  0x93   : > { %s1657_s27 = scalar_lea.vmem %s2210_s9, 512  ;;  %s1867_s24 = smov [#allocation7]  }
  0x94   : > { %p1658_p13 = scmp.ne.s32.totalorder %s2210_s9, %s1657_s27  ;;  %s1662_s7 = sshll.u32 %s1867_s24, 4  ;;  %s1663_s7 = int_to_ptr.vmem [resolvable:$false] %s1662_s7 }
  0x95   : > { %s1664_s6 = scalar_lea.vmem %s1663_s7, 1024  ;;  %p1665_p8 = scmp.lt.s32.totalorder %s2210_s9, %s1663_s7 }
  0x96   : > { %p1660_p9 = pnand %p1658_p13, %p1644_p10  ;;  %p1666_p12 = scmp.lt.s32.totalorder %s1664_s6, %s1657_s27 }
  0x98   : > { %p1661_p11 = pneg %p1660_p9  ;;  %p1667_p1 = por %p1666_p12, %p1665_p8 }
  0x9a   : > { %p1668_p5 = pnand %p1667_p1, %p1661_p11 }
  0x9c   : > { %1671 = shalt.err (!%p1668_p5)
}
  0x9d   : > { %s2682_s0 = smov 8   ;;  %s2683_s12 = smov 128  }
  0x9e   : > { %1406 = dma.hbm_to_vmem [thread:$0]  (!%p2214_p7), %s2208_s30, 512, %s2210_s9, %s2071_s18, %s2675_s29, %s2683_s12, %s2682_s0  }
  0x9f   : > { %425 = sbr.rel (%p2105_p6) target bundleno = 1122 (0x462), region = 52  ;;  %s2250_s8 = sand.u32 (!%p2105_p6), 1, %s1834_s16  }
  0xa0   : > { %s2253_s3 = sshll.u32 (!%p2105_p6), %s2250_s8, 6  ;;  %s428_s25 = scalar_lea.sflag (!%p2105_p6), [#allocation3], %s2250_s8 }
  0xa1   : > { %s2257_s5 = scalar_lea.vmem (!%p2105_p6), [#allocation2], %s2253_s3  ;;  %p2684_p8 = scmp.ne.s32.totalorder (!%p2105_p6), %s2669_s13, 0 }
  0xa6   : > { %1785 = dma.done.wait (%p2684_p8), %s428_s25, 1024  }
  0xa7   : > { %1787 = vsyncadd (%p2684_p8), %s428_s25, 4294966272  ;;  %s2685_s18 = sld [smem:[#allocation16_spill]]  ;;  %s436_s28 = sand.u32 1, %s1998_s23  }
  0xa8   : > { %s437_s9 = scalar_lea.sflag [#allocation6], %s436_s28  ;;  %p2686_p6 = scmp.ne.s32.totalorder %s2659_s26, 0 }
  0xad   : > { %s438_s29 = sand.u32 1, %s2685_s18  }
  0xae   : > { %s1351_s30 = sshll.u32 %s438_s29, 5 }
  0xaf   : > { %s2265_s17 = scalar_lea.vmem [#allocation5], %s1351_s30 }
  0xb0   : > { %1789 = dma.done.wait (%p2686_p6), %s437_s9, 512  }
  0xb1   : > { %1791 = vsyncadd (%p2686_p6), %s437_s9, 4294966784  ;;  %s447_s1 = sand.u32 1, %s1810_s10   ;;  %p2687_p7 = scmp.ne.s32.totalorder %s2679_s4, 0 }
  0xb2   : > { %s1352_s27 = sshll.u32 %s447_s1, 5 }
  0xb3   : > { %s2272_s13 = scalar_lea.vmem [#allocation7], %s1352_s27 }
  0xb4   : > { %1793 = dma.done.wait (%p2687_p7), %s437_s9, 512  }
  0xb5   : > { %1795 = vsyncadd (%p2687_p7), %s437_s9, 4294966784  ;;  %s2688_s23 = sld [smem:[#allocation19_spill]]  ;;  %v1868_v0 = vmov 0   ;;  %s2690_s12 = sld [smem:[#allocation18_spill]]  ;;  %v2290_v7 = vld [vmem:[%s2257_s5] sm:$0xff]  ;;  %v2293_v8 = vld [vmem:[%s2257_s5 + $0x8] sm:$0xff] }
  0xb6   : > { %1541 = vset.pattern.permute.xlu1 %v1868_v0  ;;  %1540 = vset.pattern.permute.xlu0 %v1868_v0  ;;  %s2689_s6 = sld [smem:[#allocation28_spill]]  ;;  %v2296_v9 = vld [vmem:[%s2257_s5 + $0x10] sm:$0xff]  ;;  %v2299_v10 = vld [vmem:[%s2257_s5 + $0x18] sm:$0xff]  ;;  %v2302_v11 = vld [vmem:[%s2257_s5 + $0x20] sm:$0xff]  ;;  %s1870_s18 = smov 120   ;;  %vm613_vm2 = vcmask 1014784  }
  0xb7   : > { %819 = vmatprep.mubr.bf16.mxu0 %v1868_v0  ;;  %1033 = vmatprep.mubr.bf16.mxu1 %v1868_v0  ;;  %v2305_v12 = vld [vmem:[%s2257_s5 + $0x28] sm:$0xff]  ;;  %v2308_v14 = vld [vmem:[%s2257_s5 + $0x30] sm:$0xff]  ;;  %v2311_v15 = vld [vmem:[%s2257_s5 + $0x38] sm:$0xff]  ;;  %s1869_s5 = smov 124   ;;  %s1871_s29 = smov 4   ;;  %vm630_vm3 = vcmask 982016  }
  0xb8   : > { %v579_v27 = vld [vmem:[%s2272_s13 + $0x8] sm:$0xff]  ;;  %v578_v28 = vld [vmem:[%s2272_s13] sm:$0xff]  ;;  %v580_v33 = vld [vmem:[%s2272_s13 + $0x10] sm:$0xff]  ;;  %vm749_vm4 = vcmask 31744   ;;  %s2693_s27 = sld [smem:[#allocation32_spill]]  ;;  %vm774_vm5 = vcmask 785408  }
  0xb9   : > { %v581_v34 = vld [vmem:[%s2272_s13 + $0x18] sm:$0xff]  ;;  %v564_v44 = vld [vmem:[%s2265_s17 + $0x10] sm:$0xff]  ;;  %v563_v46 = vld [vmem:[%s2265_s17 + $0x8] sm:$0xff]  ;;  %vm988_vm6 = vcmask 261120   ;;  %s2478_s9 = scalar_lea.vmem [#allocation9], %s2253_s3  ;;  %p2698_p3 = scmp.ne.s32.totalorder %s2670_s21, 0 }
  0xba   : > { %v565_v45 = vld [vmem:[%s2265_s17 + $0x18] sm:$0xff]  ;;  %v562_v47 = vld [vmem:[%s2265_s17] sm:$0xff]  ;;  %s2691_s17 = sld [smem:[#allocation30_spill]] }
  0xbb   : > { %p513_p10 = scmp.lt.s32.totalorder %s2688_s23, 1  ;;  %p577_p0 = scmp.lt.s32.totalorder %s2690_s12, 2 }
  0xbc   : > { %p561_p4 = scmp.gt.s32.totalorder %s2690_s12, 0  ;;  %s1385_s4 = smul.u32 24, %s2688_s23 }
  0xbd   : > { %s514_s26 = scalar_select %p513_p10, %s2688_s23, 1 }
  0xbe   : > { %s586_s25 = scalar_select %p577_p0, 1, 0 }
  0xbf   : > { %s1381_s24 = sshll.u32 %s514_s26, 5  ;;  %s2694_s26 = sld [smem:[#allocation29_spill]] }
  0xc0   : > { %s517_s0 = scalar_lea.vmem %s2689_s6, %s1381_s24  ;;  %v587_v32 = vstv %s586_s25  ;;  %s2692_s1 = smov %s2691_s17 }
  0xc1   : > { %v523_v1 = vld [vmem:[%s517_s0 + $0x10] sm:$0xff]  ;;  %v521_v2 = vld [vmem:[%s517_s0] sm:$0xff]  ;;  %v524_v3 = vld [vmem:[%s517_s0 + $0x18] sm:$0xff]  ;;  %vm588_vm0 = vcmp.eq.s32.totalorder %v587_v32, 1  ;;  %s570_s28 = scalar_select %p561_p4, 1, 0 }
  0xc2   : > { %545 = vperm.xlu1 %1541, %v523_v1   ;;  %535 = vperm.xlu0 %1540, %v521_v2   ;;  %v522_v4 = vld [vmem:[%s517_s0 + $0x8] sm:$0xff]  ;;  %s1375_s7 = sshll.u32 %s2690_s12, 1  ;;  %s2450_s6 = scalar_lea.vmem [#allocation8], %s2253_s3 }
  0xc3   : > { %v571_v51 = vstv %s570_s28  ;;  %s2695_s28 = sld [smem:[#allocation31_spill]]  ;;  %s2455_s23 = sadd.s32 %s1385_s4, %s1375_s7 }
  0xc4   : > { %vm572_vm1 = vcmp.eq.s32.totalorder %v571_v51, 1  ;;  %s1127_s12 = sshll.u32 %s2450_s6, 4  ;;  %s1376_s0 = sshll.u32 %s2455_s23, 7  ;;  %s2462_s12 = int_to_ptr.vmem [resolvable:$true] %s1127_s12 }
  0xc5   : > { %s1672_s13 = scalar_lea.vmem %s2462_s12, 1024  ;;  %s1872_s24 = smov [#allocation8]  }
  0xc6   : > { %550 = vperm.xlu1 %1541, %v524_v3   ;;  %540 = vperm.xlu0 %1540, %v522_v4   ;;  %p1673_p2 = scmp.ne.s32.totalorder %s2462_s12, %s1672_s13  ;;  %s1676_s4 = sshll.u32 %s1872_s24, 4  ;;  %s1677_s4 = int_to_ptr.vmem [resolvable:$false] %s1676_s4 }
  0xc7   : > { %s1678_s7 = scalar_lea.vmem %s1677_s4, 2048  ;;  %p1679_p11 = scmp.lt.s32.totalorder %s2462_s12, %s1677_s4 }
  0xc8   : > { %p1674_p13 = pnand %p1673_p2, %p2698_p3  ;;  %p1680_p12 = scmp.lt.s32.totalorder %s1678_s7, %s1672_s13 }
  0xca   : > { %p1675_p9 = pneg %p1674_p13  ;;  %p1681_p1 = por %p1680_p12, %p1679_p11 }
  0xcc   : > { %p1682_p5 = pnand %p1681_p1, %p1675_p9 }
 0x141   : > { %v546_v5 = vpop.permute.xlu1 %545  ;;  %v2287_v6 = vpop.permute.xlu0 %535 }
 0x142   : > { %v553_v17 = vadd.f32 %v2287_v6, %v2290_v7  ;;  %v554_v18 = vadd.f32 %v2287_v6, %v2293_v8  ;;  %v557_v21 = vadd.f32 %v546_v5, %v2302_v11  ;;  %v558_v22 = vadd.f32 %v546_v5, %v2305_v12 }
 0x143   : > { %v582_v35 = vadd.f32 %v578_v28, %v2287_v6  ;;  %v584_v36 = vadd.f32 %v580_v33, %v546_v5  ;;  %v568_v48 = vadd.f32 %v564_v44, %v546_v5  ;;  %v566_v52 = vadd.f32 %v562_v47, %v2287_v6  ;;  %v650_v28 = vld [vmem:[%s2692_s1 + $0x38] sm:$0xff]  ;;  %v643_v33 = vld [vmem:[%s2692_s1] sm:$0xff]  ;;  %v926_v44 = vld [vmem:[%s2693_s27 + $0x30] sm:$0xff] }
 0x145   : > { %v541_v13 = vpop.permute.xlu0 %540  ;;  %v551_v16 = vpop.permute.xlu1 %550  ;;  %v589_v39 = vsel %vm588_vm0, %v582_v35, 0.0  ;;  %v591_v41 = vsel %vm588_vm0, %v584_v36, 0.0  ;;  %v575_v53 = vsel %vm572_vm1, %v568_v48, 0.0  ;;  %v573_v56 = vsel %vm572_vm1, %v566_v52, 0.0  ;;  %v645_v36 = vld [vmem:[%s2692_s1 + $0x10] sm:$0xff] }
 0x146   : > { %v555_v19 = vadd.f32 %v541_v13, %v2296_v9  ;;  %v556_v20 = vadd.f32 %v541_v13, %v2299_v10  ;;  %v559_v23 = vadd.f32 %v551_v16, %v2308_v14  ;;  %v560_v24 = vadd.f32 %v551_v16, %v2311_v15 }
 0x147   : > { %v583_v31 = vadd.f32 %v579_v27, %v541_v13  ;;  %v585_v37 = vadd.f32 %v581_v34, %v551_v16  ;;  %v569_v49 = vadd.f32 %v565_v45, %v551_v16  ;;  %v567_v50 = vadd.f32 %v563_v46, %v541_v13  ;;  %v649_v27 = vld [vmem:[%s2692_s1 + $0x30] sm:$0xff]  ;;  %v644_v34 = vld [vmem:[%s2692_s1 + $0x8] sm:$0xff]  ;;  %v927_v45 = vld [vmem:[%s2693_s27 + $0x38] sm:$0xff] }
 0x148   : > { %v595_v25 = vpack.c.bf16 %v556_v20, %v554_v18  ;;  %v594_v26 = vpack.c.bf16 %v555_v19, %v553_v17  ;;  %v598_v29 = vpack.c.bf16 %v560_v24, %v558_v22  ;;  %v597_v30 = vpack.c.bf16 %v559_v23, %v557_v21  ;;  %v647_v23 = vld [vmem:[%s2691_s17 + $0x20] sm:$0xff]  ;;  %v648_v24 = vld [vmem:[%s2692_s1 + $0x28] sm:$0xff]  ;;  %s1107_s17 = scalar_lea.sflag [#allocation4], %s2250_s8 }
 0x149   : > { %v590_v38 = vsel %vm588_vm0, %v583_v31, 0.0  ;;  %v592_v42 = vsel %vm588_vm0, %v585_v37, 0.0  ;;  %v576_v54 = vsel %vm572_vm1, %v569_v49, 0.0  ;;  %v574_v55 = vsel %vm572_vm1, %v567_v50, 0.0  ;;  %v646_v37 = vld [vmem:[%s2692_s1 + $0x18] sm:$0xff] }
 0x14a   : > { %607 = vrot.lane.b32.xlu1 %v595_v25, %s1869_s5  ;;  %605 = vrot.lane.b32.xlu0 %v594_v26, %s1869_s5  ;;  %v599_v40 = vpack.c.bf16 %v590_v38, %v589_v39  ;;  %v600_v43 = vpack.c.bf16 %v592_v42, %v591_v41  ;;  %v596_v57 = vpack.c.bf16 %v576_v54, %v575_v53  ;;  %v920_v38 = vld [vmem:[%s2693_s27] sm:$0xff]  ;;  %v921_v39 = vld [vmem:[%s2693_s27 + $0x8] sm:$0xff] }
 0x14b   : > { %v593_v58 = vpack.c.bf16 %v574_v55, %v573_v56  ;;  %v923_v41 = vld [vmem:[%s2693_s27 + $0x18] sm:$0xff]  ;;  %v924_v42 = vld [vmem:[%s2693_s27 + $0x20] sm:$0xff] }
 0x14e   : > { %611 = vrot.lane.b32.xlu1 %v598_v29, %s1869_s5  ;;  %609 = vrot.lane.b32.xlu0 %v597_v30, %s1869_s5 }
 0x152   : > { %620 = vrot.lane.b32.xlu1 %v595_v25, %s1870_s18  ;;  %618 = vrot.lane.b32.xlu0 %v594_v26, %s1870_s18 }
 0x156   : > { %624 = vrot.lane.b32.xlu1 %v597_v30, %s1870_s18  ;;  %622 = vrot.lane.b32.xlu0 %v599_v40, %s1870_s18  ;;  %v922_v40 = vld [vmem:[%s2693_s27 + $0x10] sm:$0xff] }
 0x15a   : > { %628 = vrot.lane.b32.xlu1 %v600_v43, %s1870_s18  ;;  %626 = vrot.lane.b32.xlu0 %v598_v29, %s1870_s18  ;;  %v925_v43 = vld [vmem:[%s2693_s27 + $0x28] sm:$0xff]  ;;  %s2696_s18 = sld [smem:[#allocation33_spill]] }
 0x15e   : > { %717 = vrot.lane.b32.xlu1 %v595_v25, %s1871_s29  ;;  %715 = vrot.lane.b32.xlu0 %v594_v26, %s1871_s29 }
 0x160   : > { %s2472_s30 = scalar_lea.hbm %s2696_s18, %s1376_s0 }
 0x162   : > { %721 = vrot.lane.b32.xlu1 %v597_v30, %s1871_s29  ;;  %723 = vrot.lane.b32.xlu0 %v598_v29, %s1871_s29 }
 0x166   : > { %719 = vrot.lane.b32.xlu1 %v596_v57, %s1871_s29  ;;  %713 = vrot.lane.b32.xlu0 %v593_v58, %s1871_s29 }
 0x1bc   : > { %v608_v59 = vpop.permute.xlu1 %607  ;;  %v606_v60 = vpop.permute.xlu0 %605 }
 0x1bd   : > { %729 = vrot.lane.b32.xlu1 %v608_v59, %s1871_s29  ;;  %725 = vrot.lane.b32.xlu0 %v606_v60, %s1871_s29  ;;  %v614_v3 = vsel %vm613_vm2, %v606_v60, %v608_v59 }
 0x1c0   : > { %v612_v61 = vpop.permute.xlu1 %611  ;;  %v610_v62 = vpop.permute.xlu0 %609 }
 0x1c1   : > { %731 = vrot.lane.b32.xlu1 %v610_v62, %s1871_s29  ;;  %735 = vrot.lane.b32.xlu0 %v612_v61, %s1871_s29  ;;  %v615_v2 = vsel %vm613_vm2, %v610_v62, %v612_v61 }
 0x1c4   : > { %v621_v63 = vpop.permute.xlu1 %620  ;;  %v619_v1 = vpop.permute.xlu0 %618 }
 0x1c5   : > { %733 = vrot.lane.b32.xlu1 %v615_v2, %s1871_s29  ;;  %727 = vrot.lane.b32.xlu0 %v614_v3, %s1871_s29  ;;  %v631_v17 = vsel %vm630_vm3, %v619_v1, %v621_v63  ;;  %v1542_v3 = vld [vmem:[%s2694_s26] sm:$0xff]  }
 0x1c8   : > { %v625_v4 = vpop.permute.xlu1 %624  ;;  %v623_v5 = vpop.permute.xlu0 %622 }
 0x1c9   : > { %737 = vrot.lane.b32.xlu0 %v619_v1, %s1871_s29  ;;  %v632_v6 = vsel %vm630_vm3, %v621_v63, %v623_v5  ;;  %v1544_v5 = vld [vmem:[%s2694_s26 + $0x10] sm:$0xff]  }
 0x1ca   : > { %741 = vrot.lane.b32.xlu1 %v632_v6, %s1871_s29  ;;  %v1545_v6 = vld [vmem:[%s2694_s26 + $0x18] sm:$0xff]  }
 0x1cc   : > { %v629_v13 = vpop.permute.xlu1 %628  ;;  %v627_v16 = vpop.permute.xlu0 %626 }
 0x1cd   : > { %739 = vrot.lane.b32.xlu0 %v631_v17, %s1871_s29  ;;  %v633_v18 = vsel %vm630_vm3, %v625_v4, %v627_v16  ;;  %v634_v21 = vsel %vm630_vm3, %v627_v16, %v629_v13 }
 0x1ce   : > { %745 = vrot.lane.b32.xlu1 %v633_v18, %s1871_s29 }
 0x1d0   : > { %v718_v19 = vpop.permute.xlu1 %717  ;;  %v716_v20 = vpop.permute.xlu0 %715 }
 0x1d1   : > { %747 = vrot.lane.b32.xlu0 %v634_v21, %s1871_s29  ;;  %v751_v22 = vsel %vm749_vm4, %v716_v20, %v718_v19 }
 0x1d2   : > { %743 = vrot.lane.b32.xlu1 %v625_v4, %s1871_s29  ;;  %787 = vmatprep.subr.bf16.mxu0 %v751_v22  ;;  %v1543_v4 = vld [vmem:[%s2694_s26 + $0x8] sm:$0xff]   ;;  %s2697_s29 = smov %s2696_s18 }
 0x1d4   : > { %v722_v25 = vpop.permute.xlu1 %721  ;;  %v724_v26 = vpop.permute.xlu0 %723 }
 0x1d5   : > { %673 = vperm.xlu0 %1540, %v647_v23   ;;  %v753_v32 = vsel %vm749_vm4, %v722_v25, %v724_v26 }
 0x1d6   : > { %678 = vperm.xlu1 %1541, %v648_v24  }
 0x1d8   : > { %v714_v29 = vpop.permute.xlu0 %713  ;;  %v720_v31 = vpop.permute.xlu1 %719 }
 0x1d9   : > { %683 = vperm.xlu0 %1540, %v649_v27   ;;  %v750_v30 = vsel %vm749_vm4, %v714_v29, %v716_v20  ;;  %v752_v35 = vsel %vm749_vm4, %v720_v31, %v722_v25 }
 0x1da   : > { %688 = vperm.xlu1 %1541, %v650_v28   ;;  %788 = vmatpush1.bf16.msra.mxu0 %v750_v30 }
 0x1db   : > { %789 = vmatprep.subr.bf16.mxu0 %v753_v32 }
 0x1dd   : > { %653 = vperm.xlu0 %1540, %v643_v33  }
 0x1de   : > { %658 = vperm.xlu1 %1541, %v644_v34   ;;  %790 = vmatpush1.bf16.msra.mxu0 %v752_v35 }
 0x1e1   : > { %663 = vperm.xlu0 %1540, %v645_v36  }
 0x1e2   : > { %668 = vperm.xlu1 %1541, %v646_v37  }
 0x1e5   : > { %930 = vperm.xlu0 %1540, %v920_v38  }
 0x1e6   : > { %935 = vperm.xlu1 %1541, %v921_v39  }
 0x1e9   : > { %940 = vperm.xlu0 %1540, %v922_v40  }
 0x1ea   : > { %945 = vperm.xlu1 %1541, %v923_v41  }
 0x1ed   : > { %950 = vperm.xlu0 %1540, %v924_v42  }
 0x1ee   : > { %955 = vperm.xlu1 %1541, %v925_v43  }
 0x1f1   : > { %960 = vperm.xlu0 %1540, %v926_v44  }
 0x1f2   : > { %965 = vperm.xlu1 %1541, %v927_v45  }
 0x22f   : > { %v730_v46 = vpop.permute.xlu1 %729  ;;  %v726_v47 = vpop.permute.xlu0 %725 }
 0x233   : > { %v732_v48 = vpop.permute.xlu1 %731  ;;  %v736_v49 = vpop.permute.xlu0 %735 }
 0x237   : > { %v734_v50 = vpop.permute.xlu1 %733  ;;  %v728_v51 = vpop.permute.xlu0 %727 }
 0x238   : > { %v755_v52 = vsel %vm749_vm4, %v728_v51, %v730_v46  ;;  %v754_v53 = vsel %vm749_vm4, %v726_v47, %v728_v51  ;;  %v757_v54 = vsel %vm749_vm4, %v734_v50, %v736_v49  ;;  %v756_v57 = vsel %vm749_vm4, %v732_v48, %v734_v50 }
 0x239   : > { %791 = vmatprep.subr.bf16.mxu0 %v755_v52 }
 0x23a   : > { %792 = vmatpush1.bf16.msra.mxu0 %v754_v53 }
 0x23b   : > { %793 = vmatprep.subr.bf16.mxu0 %v757_v54  ;;  %v738_v55 = vpop.permute.xlu0 %737 }
 0x23c   : > { %v742_v56 = vpop.permute.xlu1 %741 }
 0x23e   : > { %794 = vmatpush1.bf16.msra.mxu0 %v756_v57 }
 0x23f   : > { %v740_v58 = vpop.permute.xlu0 %739 }
 0x240   : > { %v746_v59 = vpop.permute.xlu1 %745  ;;  %v759_v60 = vsel %vm749_vm4, %v740_v58, %v742_v56  ;;  %v758_v61 = vsel %vm749_vm4, %v738_v55, %v740_v58 }
 0x241   : > { %795 = vmatprep.subr.bf16.mxu0 %v759_v60 }
 0x242   : > { %796 = vmatpush1.bf16.msra.mxu0 %v758_v61 }
 0x243   : > { %v748_v62 = vpop.permute.xlu0 %747 }
 0x244   : > { %v744_v63 = vpop.permute.xlu1 %743  ;;  %v761_v1 = vsel %vm749_vm4, %v746_v59, %v748_v62 }
 0x245   : > { %797 = vmatprep.subr.bf16.mxu0 %v761_v1  ;;  %v760_v2 = vsel %vm749_vm4, %v744_v63, %v746_v59 }
 0x246   : > { %798 = vmatpush1.bf16.msra.mxu0 %v760_v2 }
 0x249   : > { %1361 = vmatmul.mubr.msk.bf16.vlgmr.msra.gmra.mrb[0].mxu0 %vm774_vm5, %v1542_v3 }
 0x24a   : > { %829 = vmatprep.mubr.bf16.mxu0 %v1868_v0 }
 0x251   : > { %1362 = vmatmul.mubr.msk.bf16.gmra.mrb[4].mxu0 %vm774_vm5, %v1543_v4 }
 0x252   : > { %839 = vmatprep.mubr.bf16.mxu0 %v1868_v0 }
 0x254   : > { %v674_v19 = vpop.permute.xlu0 %673 }
 0x255   : > { %v679_v22 = vpop.permute.xlu1 %678 }
 0x258   : > { %v684_v25 = vpop.permute.xlu0 %683 }
 0x259   : > { %1363 = vmatmul.mubr.msk.bf16.gmra.mrb[8].mxu0 %vm774_vm5, %v1544_v5  ;;  %v689_v26 = vpop.permute.xlu1 %688 }
 0x25a   : > { %849 = vmatprep.mubr.bf16.mxu0 %v1868_v0 }
 0x25c   : > { %v654_v35 = vpop.permute.xlu0 %653 }
 0x25d   : > { %v659_v40 = vpop.permute.xlu1 %658 }
 0x260   : > { %v664_v53 = vpop.permute.xlu0 %663 }
 0x261   : > { %1364 = vmatmul.mubr.msk.bf16.gmra.mrb[12].mxu0 %vm774_vm5, %v1545_v6  ;;  %v669_v58 = vpop.permute.xlu1 %668 }
 0x31c   : > { %v821_v13 = vpop.f32.mrb[0].mxu0 }
 0x31d   : > { %v823_v16 = vpop.f32.mrb[1].mxu0  ;;  %v822_v38 = vadd.f32 %v821_v13, %v654_v35 }
 0x31e   : > { %v825_v17 = vpop.f32.mrb[2].mxu0  ;;  %v824_v41 = vadd.f32 %v823_v16, %v654_v35 }
 0x31f   : > { %v827_v18 = vpop.f32.mrb[3].mxu0  ;;  %v826_v43 = vadd.f32 %v825_v17, %v659_v40 }
 0x320   : > { %v828_v44 = vadd.f32 %v827_v18, %v659_v40 }
 0x324   : > { %v831_v20 = vpop.f32.mrb[4].mxu0 }
 0x325   : > { %v833_v21 = vpop.f32.mrb[5].mxu0  ;;  %v832_v56 = vadd.f32 %v831_v20, %v664_v53 }
 0x326   : > { %v835_v23 = vpop.f32.mrb[6].mxu0  ;;  %v834_v59 = vadd.f32 %v833_v21, %v664_v53  ;;  %v1547_v53 = vld [vmem:[%s2695_s28 + $0x8] sm:$0xff]  }
 0x327   : > { %v837_v24 = vpop.f32.mrb[7].mxu0  ;;  %v836_v62 = vadd.f32 %v835_v23, %v669_v58 }
 0x328   : > { %v838_v1 = vadd.f32 %v837_v24, %v669_v58 }
 0x32c   : > { %v841_v27 = vpop.f32.mrb[8].mxu0 }
 0x32d   : > { %v842_v28 = vadd.f32 %v841_v27, %v674_v19  ;;  %v843_v29 = vpop.f32.mrb[9].mxu0 }
 0x32e   : > { %v844_v30 = vadd.f32 %v843_v29, %v674_v19  ;;  %v845_v31 = vpop.f32.mrb[10].mxu0 }
 0x32f   : > { %v860_v32 = vmul.f32 0.5, %v842_v28  ;;  %v846_v33 = vadd.f32 %v845_v31, %v679_v22  ;;  %v847_v34 = vpop.f32.mrb[11].mxu0 }
 0x330   : > { %v861_v36 = vmul.f32 0.5, %v844_v30  ;;  %v848_v37 = vadd.f32 %v847_v34, %v679_v22 }
 0x331   : > { %1550 = vtanh.f32 %v860_v32  ;;  %v862_v39 = vmul.f32 0.5, %v846_v33 }
 0x332   : > { %1552 = vtanh.f32 %v861_v36  ;;  %v863_v42 = vmul.f32 0.5, %v848_v37 }
 0x333   : > { %1554 = vtanh.f32 %v862_v39 }
 0x334   : > { %1556 = vtanh.f32 %v863_v42  ;;  %v851_v45 = vpop.f32.mrb[12].mxu0 }
 0x335   : > { %1558 = vtanh.f32 %v822_v38  ;;  %v852_v46 = vadd.f32 %v851_v45, %v684_v25  ;;  %v853_v47 = vpop.f32.mrb[13].mxu0 }
 0x336   : > { %1560 = vtanh.f32 %v824_v41  ;;  %v854_v48 = vadd.f32 %v853_v47, %v684_v25  ;;  %v855_v49 = vpop.f32.mrb[14].mxu0 }
 0x337   : > { %1562 = vtanh.f32 %v826_v43  ;;  %v864_v50 = vmul.f32 0.5, %v852_v46  ;;  %v856_v51 = vadd.f32 %v855_v49, %v689_v26  ;;  %v857_v52 = vpop.f32.mrb[15].mxu0 }
 0x338   : > { %1564 = vtanh.f32 %v828_v44  ;;  %v865_v54 = vmul.f32 0.5, %v854_v48  ;;  %v858_v55 = vadd.f32 %v857_v52, %v689_v26  ;;  %v1546_v52 = vld [vmem:[%s2695_s28] sm:$0xff]  }
 0x339   : > { %1566 = vtanh.f32 %v864_v50  ;;  %v866_v57 = vmul.f32 0.5, %v856_v51 }
 0x33a   : > { %1568 = vtanh.f32 %v865_v54  ;;  %v867_v60 = vmul.f32 0.5, %v858_v55  ;;  %v1548_v54 = vld [vmem:[%s2695_s28 + $0x10] sm:$0xff]   ;;  %v1549_v55 = vld [vmem:[%s2695_s28 + $0x18] sm:$0xff]  }
 0x33b   : > { %v1551_v61 = vpop.eup %1550  ;;  %1570 = vtanh.f32 %v866_v57 }
 0x33c   : > { %v1553_v63 = vpop.eup %1552  ;;  %v876_v2 = vmul.f32 0.5, %v1551_v61  ;;  %1572 = vtanh.f32 %v867_v60  ;;  %v936_v60 = vpop.permute.xlu1 %935 }
 0x33d   : > { %v1555_v3 = vpop.eup %1554  ;;  %1574 = vtanh.f32 %v832_v56  ;;  %v877_v4 = vmul.f32 0.5, %v1553_v63  ;;  %v931_v56 = vpop.permute.xlu0 %930 }
 0x33e   : > { %v1557_v5 = vpop.eup %1556  ;;  %1576 = vtanh.f32 %v834_v59  ;;  %v884_v6 = vadd.f32 0.5, %v876_v2  ;;  %v878_v13 = vmul.f32 0.5, %v1555_v3 }
 0x33f   : > { %v1559_v16 = vpop.eup %1558  ;;  %1578 = vtanh.f32 %v836_v62  ;;  %v879_v17 = vmul.f32 0.5, %v1557_v5  ;;  %v885_v18 = vadd.f32 0.5, %v877_v4 }
 0x340   : > { %v1561_v19 = vpop.eup %1560  ;;  %1580 = vtanh.f32 %v838_v1  ;;  %v886_v20 = vadd.f32 0.5, %v878_v13  ;;  %v900_v21 = vmul.f32 %v1559_v16, %v884_v6 }
 0x341   : > { %v1563_v22 = vpop.eup %1562  ;;  %v887_v23 = vadd.f32 0.5, %v879_v17  ;;  %v901_v24 = vmul.f32 %v1561_v19, %v885_v18  ;;  %v941_v16 = vpop.permute.xlu0 %940 }
 0x342   : > { %v1565_v25 = vpop.eup %1564  ;;  %v902_v26 = vmul.f32 %v1563_v22, %v886_v20 }
 0x343   : > { %v1567_v27 = vpop.eup %1566  ;;  %v903_v28 = vmul.f32 %v1565_v25, %v887_v23 }
 0x344   : > { %v1569_v29 = vpop.eup %1568  ;;  %v880_v30 = vmul.f32 0.5, %v1567_v27  ;;  %v916_v31 = vpack.c.bf16 %v902_v26, %v900_v21 }
 0x345   : > { %v1571_v32 = vpop.eup %1570  ;;  %v881_v33 = vmul.f32 0.5, %v1569_v29  ;;  %v917_v34 = vpack.c.bf16 %v903_v28, %v901_v24 }
 0x346   : > { %v1573_v35 = vpop.eup %1572  ;;  %v888_v36 = vadd.f32 0.5, %v880_v30  ;;  %v882_v37 = vmul.f32 0.5, %v1571_v32 }
 0x347   : > { %v1575_v38 = vpop.eup %1574  ;;  %v889_v39 = vadd.f32 0.5, %v881_v33  ;;  %v883_v40 = vmul.f32 0.5, %v1573_v35  ;;  %1001 = vmatprep.subr.bf16.mxu1 %v917_v34 }
 0x348   : > { %v1577_v41 = vpop.eup %1576  ;;  %v890_v42 = vadd.f32 0.5, %v882_v37  ;;  %1002 = vmatpush1.bf16.msra.mxu1 %v916_v31  ;;  %v904_v43 = vmul.f32 %v1575_v38, %v888_v36 }
 0x349   : > { %v1579_v44 = vpop.eup %1578  ;;  %v891_v45 = vadd.f32 0.5, %v883_v40  ;;  %v905_v46 = vmul.f32 %v1577_v41, %v889_v39 }
 0x34a   : > { %v1581_v47 = vpop.eup %1580  ;;  %v906_v48 = vmul.f32 %v1579_v44, %v890_v42 }
 0x34b   : > { %v907_v49 = vmul.f32 %v1581_v47, %v891_v45 }
 0x34c   : > { %v918_v50 = vpack.c.bf16 %v906_v48, %v904_v43 }
 0x34d   : > { %v919_v51 = vpack.c.bf16 %v907_v49, %v905_v46 }
 0x34f   : > { %1003 = vmatprep.subr.bf16.mxu1 %v919_v51 }
 0x350   : > { %1004 = vmatpush1.bf16.msra.mxu1 %v918_v50 }
 0x353   : > { %1369 = vmatmul.mubr.msk.bf16.vlgmr.msra.gmra.mrb[0].mxu1 %vm988_vm6, %v1546_v52 }
 0x354   : > { %1043 = vmatprep.mubr.bf16.mxu1 %v1868_v0 }
 0x35b   : > { %1370 = vmatmul.mubr.msk.bf16.gmra.mrb[4].mxu1 %vm988_vm6, %v1547_v53 }
 0x35c   : > { %1053 = vmatprep.mubr.bf16.mxu1 %v1868_v0 }
 0x363   : > { %1371 = vmatmul.mubr.msk.bf16.gmra.mrb[8].mxu1 %vm988_vm6, %v1548_v54 }
 0x364   : > { %1063 = vmatprep.mubr.bf16.mxu1 %v1868_v0 }
 0x36b   : > { %1372 = vmatmul.mubr.msk.bf16.gmra.mrb[12].mxu1 %vm988_vm6, %v1549_v55 }
 0x426   : > { %v1035_v57 = vpop.f32.mrb[0].mxu1 }
 0x427   : > { %v1036_v58 = vadd.f32 %v1035_v57, %v931_v56  ;;  %v1037_v59 = vpop.f32.mrb[1].mxu1 }
 0x428   : > { %v1038_v61 = vadd.f32 %v1037_v59, %v931_v56  ;;  %v1039_v62 = vpop.f32.mrb[2].mxu1 }
 0x429   : > { %v1074_v63 = vadd.f32 %v1036_v58, %v2290_v7  ;;  %v1040_v1 = vadd.f32 %v1039_v62, %v936_v60  ;;  %v1041_v2 = vpop.f32.mrb[3].mxu1 }
 0x42a   : > { %v1075_v0 = vadd.f32 %v1038_v61, %v2293_v8  ;;  %v1042_v3 = vadd.f32 %v1041_v2, %v936_v60 }
 0x42b   : > { %v1082_v4 = vmul.f32 0.70710677, %v1074_v63  ;;  %v1076_v5 = vadd.f32 %v1040_v1, %v2296_v9 }
 0x42c   : > { %v1083_v6 = vmul.f32 0.70710677, %v1075_v0  ;;  %v1077_v13 = vadd.f32 %v1042_v3, %v2299_v10  ;;  %v946_v10 = vpop.permute.xlu1 %945 }
 0x42d   : > { %1090 = vst [vmem:[%s2450_s6] sm:$0xff] %v1082_v4  ;;  %v1084_v7 = vmul.f32 0.70710677, %v1076_v5 }
 0x42e   : > { %1091 = vst [vmem:[%s2450_s6 + $0x8] sm:$0xff] %v1083_v6  ;;  %v1085_v8 = vmul.f32 0.70710677, %v1077_v13  ;;  %v1045_v17 = vpop.f32.mrb[4].mxu1 }
 0x42f   : > { %1092 = vst [vmem:[%s2450_s6 + $0x10] sm:$0xff] %v1084_v7  ;;  %v1046_v9 = vadd.f32 %v1045_v17, %v941_v16  ;;  %v1047_v18 = vpop.f32.mrb[5].mxu1 }
 0x430   : > { %1093 = vst [vmem:[%s2450_s6 + $0x18] sm:$0xff] %v1085_v8  ;;  %v1048_v19 = vadd.f32 %v1047_v18, %v941_v16  ;;  %v1049_v20 = vpop.f32.mrb[6].mxu1 }
 0x431   : > { %v1078_v21 = vadd.f32 %v1046_v9, %v2302_v11  ;;  %v1050_v22 = vadd.f32 %v1049_v20, %v946_v10  ;;  %v1051_v23 = vpop.f32.mrb[7].mxu1  ;;  %v951_v11 = vpop.permute.xlu0 %950 }
 0x432   : > { %v1079_v24 = vadd.f32 %v1048_v19, %v2305_v12  ;;  %v1052_v25 = vadd.f32 %v1051_v23, %v946_v10 }
 0x433   : > { %v1086_v26 = vmul.f32 0.70710677, %v1078_v21  ;;  %v1080_v27 = vadd.f32 %v1050_v22, %v2308_v14 }
 0x434   : > { %v1087_v28 = vmul.f32 0.70710677, %v1079_v24  ;;  %v1081_v29 = vadd.f32 %v1052_v25, %v2311_v15  ;;  %v956_v15 = vpop.permute.xlu1 %955 }
 0x435   : > { %1094 = vst [vmem:[%s2450_s6 + $0x20] sm:$0xff] %v1086_v26  ;;  %v1088_v30 = vmul.f32 0.70710677, %v1080_v27 }
 0x436   : > { %1095 = vst [vmem:[%s2450_s6 + $0x28] sm:$0xff] %v1087_v28  ;;  %v1089_v12 = vmul.f32 0.70710677, %v1081_v29  ;;  %v1055_v14 = vpop.f32.mrb[8].mxu1 }
 0x437   : > { %1096 = vst [vmem:[%s2450_s6 + $0x30] sm:$0xff] %v1088_v30  ;;  %v1056_v31 = vadd.f32 %v1055_v14, %v951_v11  ;;  %v1057_v32 = vpop.f32.mrb[9].mxu1 }
 0x438   : > { %1097 = vst [vmem:[%s2450_s6 + $0x38] sm:$0xff] %v1089_v12  ;;  %v1058_v33 = vadd.f32 %v1057_v32, %v951_v11  ;;  %v1059_v34 = vpop.f32.mrb[10].mxu1 }
 0x439   : > { %1098 = vst [vmem:[%s2478_s9] sm:$0xff] %v1056_v31  ;;  %v1060_v35 = vadd.f32 %v1059_v34, %v956_v15  ;;  %v1061_v36 = vpop.f32.mrb[11].mxu1 }
 0x43a   : > { %1685 = shalt.err (!%p1682_p5)
}
 0x43b   : > { %s1686_s3 = scalar_lea.hbm %s2472_s30, 1024  ;;  %s1690_s5 = scalar_lea.hbm %s2697_s29, 6144 }
 0x43c   : > { %p1687_p8 = scmp.ne.s32.totalorder %s2472_s30, %s1686_s3  ;;  %p1691_p10 = scmp.lt.u32.totalorder %s2472_s30, %s2697_s29 }
 0x43d   : > { %p1692_p0 = scmp.lt.u32.totalorder %s1690_s5, %s1686_s3  ;;  %p1694_p2 = scmp.lt.u32.totalorder %s1686_s3, %s2472_s30 }
 0x43e   : > { %p1688_p6 = pnand %p1687_p8, %p2698_p3 }
 0x43f   : > { %p1693_p4 = por %p1692_p0, %p1691_p10 }
 0x440   : > { %p1689_p7 = pneg %p1688_p6 }
 0x441   : > { %p1695_p13 = por %p1694_p2, %p1693_p4 }
 0x443   : > { %p1696_p9 = pnand %p1695_p13, %p1689_p7 }
 0x445   : > { %1699 = shalt.err (!%p1696_p9)
}
 0x446   : > { %s2639_s13 = smov 256   ;;  %s2640_s4 = smov 768   ;;  %1099 = vst [vmem:[%s2478_s9 + $0x8] sm:$0xff] %v1058_v33  ;;  %v1062_v37 = vadd.f32 %v1061_v36, %v956_v15  ;;  %1100 = vst [vmem:[%s2478_s9 + $0x10] sm:$0xff] %v1060_v35  ;;  %v961_v38 = vpop.permute.xlu0 %960  ;;  %v1065_v39 = vpop.f32.mrb[12].mxu1 }
 0x447   : > { %s1875_s7 = smov 16   ;;  %s1145_s3 = sshll.u32 %s2478_s9, 4  ;;  %v1066_v40 = vadd.f32 %v1065_v39, %v961_v38  ;;  %v1067_v41 = vpop.f32.mrb[13].mxu1  ;;  %v966_v42 = vpop.permute.xlu1 %965  ;;  %s2512_s3 = int_to_ptr.vmem [resolvable:$true] %s1145_s3 }
 0x448   : > { %1393 = dma.vmem_to_hbm [thread:$0]  (%p2698_p3), %s2462_s12, 1024, %s2472_s30, %s1107_s17, %s2639_s13, %s2640_s4, %s1875_s7   ;;  %v1068_v43 = vadd.f32 %v1067_v41, %v961_v38  ;;  %v1069_v44 = vpop.f32.mrb[14].mxu1 }
 0x449   : > { %1101 = vst [vmem:[%s2478_s9 + $0x18] sm:$0xff] %v1062_v37  ;;  %1102 = vst [vmem:[%s2478_s9 + $0x20] sm:$0xff] %v1066_v40  ;;  %v1070_v45 = vadd.f32 %v1069_v44, %v966_v42  ;;  %v1071_v46 = vpop.f32.mrb[15].mxu1  ;;  %s2699_s17 = sld [smem:[#allocation34_spill]]  ;;  %s1112_s5 = scalar_lea.sflag [#allocation10], %s2250_s8 }
 0x44a   : > { %1103 = vst [vmem:[%s2478_s9 + $0x28] sm:$0xff] %v1068_v43  ;;  %v1072_v47 = vadd.f32 %v1071_v46, %v966_v42  ;;  %s1700_s18 = scalar_lea.vmem %s2512_s3, 1024  ;;  %s1876_s24 = smov [#allocation9]  }
 0x44b   : > { %1104 = vst [vmem:[%s2478_s9 + $0x30] sm:$0xff] %v1070_v45  ;;  %p1701_p11 = scmp.ne.s32.totalorder %s2512_s3, %s1700_s18  ;;  %s1704_s13 = sshll.u32 %s1876_s24, 4  ;;  %s1705_s13 = int_to_ptr.vmem [resolvable:$false] %s1704_s13 }
 0x44c   : > { %1105 = vst [vmem:[%s2478_s9 + $0x38] sm:$0xff] %v1072_v47  ;;  %s1706_s4 = scalar_lea.vmem %s1705_s13, 2048  ;;  %p1707_p5 = scmp.lt.s32.totalorder %s2512_s3, %s1705_s13 }
 0x44d   : > { %p1702_p12 = pnand %p1701_p11, %p2698_p3  ;;  %p1708_p8 = scmp.lt.s32.totalorder %s1706_s4, %s1700_s18 }
 0x44f   : > { %s2700_s6 = smov %s2699_s17  ;;  %s2521_s25 = scalar_lea.hbm %s2699_s17, %s1376_s0 }
 0x450   : > { %p1703_p1 = pneg %p1702_p12  ;;  %p1709_p6 = por %p1708_p8, %p1707_p5 }
 0x452   : > { %p1710_p7 = pnand %p1709_p6, %p1703_p1 }
 0x454   : > { %1713 = shalt.err (!%p1710_p7)
}
 0x455   : > { %s1714_s23 = scalar_lea.hbm %s2521_s25, 1024  ;;  %s1718_s12 = scalar_lea.hbm %s2700_s6, 6144 }
 0x456   : > { %p1715_p10 = scmp.ne.s32.totalorder %s2521_s25, %s1714_s23  ;;  %p1719_p2 = scmp.lt.u32.totalorder %s2521_s25, %s2700_s6 }
 0x457   : > { %p1720_p13 = scmp.lt.u32.totalorder %s1718_s12, %s1714_s23  ;;  %p1722_p11 = scmp.lt.u32.totalorder %s1714_s23, %s2521_s25 }
 0x458   : > { %p1716_p0 = pnand %p1715_p10, %p2698_p3 }
 0x459   : > { %p1721_p9 = por %p1720_p13, %p1719_p2 }
 0x45a   : > { %p1717_p4 = pneg %p1716_p0 }
 0x45b   : > { %p1723_p12 = por %p1722_p11, %p1721_p9 }
 0x45d   : > { %p1724_p1 = pnand %p1723_p12, %p1717_p4 }
 0x45f   : > { %1727 = shalt.err (!%p1724_p1)
}
 0x460   : > { %s2701_s4 = smov 768   ;;  %s2702_s17 = smov 256  }
 0x461   : > { %1394 = dma.vmem_to_hbm [thread:$0]  (%p2698_p3), %s2512_s3, 1024, %s2521_s25, %s1112_s5, %s2702_s17, %s2701_s4, %s1875_s7  }
 0x462 PF: > { %p1415_p5 = scmp.ge.s32.totalorder %s1858_s22, 2  ;;  %s1160_s18 = sand.u32 1, %s1830_s15  }
 0x463   : > { %p2703_p8 = scmp.ne.s32.totalorder %s2671_s20, 0  ;;  %s1161_s24 = scalar_lea.sflag [#allocation4], %s1160_s18 }
 0x465   : > { %p1408_p6 = pnand %p1415_p5, %p2703_p8 }
 0x467   : > { %1797 = dma.done.wait (!%p1408_p6), %s1161_s24, 1024  }
 0x468   : > { %1799 = vsyncadd (!%p1408_p6), %s1161_s24, 4294966272  ;;  %s1170_s21 = scalar_lea.sflag [#allocation10], %s1160_s18 }
 0x469   : > { %1801 = dma.done.wait (!%p1408_p6), %s1170_s21, 1024  }
 0x46a   : > { %1803 = vsyncadd (!%p1408_p6), %s1170_s21, 4294966272  ;;  %s32_s22 = sadd.s32 1, %s1858_s22   ;;  %s2705_s12 = sld [smem:[#allocation16_spill]] }
 0x46b   : > { %p2557_p7 = scmp.ge.s32.totalorder %s32_s22, 8   ;;  %s2706_s15 = sld [smem:[#allocation24_spill]] }
 0x46c   : > { %s2707_s20 = sld [smem:[#allocation17_spill]]  ;;  %s2708_s17 = sld [smem:[#allocation25_spill]] }
 0x46d   : > { %s2709_s18 = sld [smem:[#allocation20_spill]]  ;;  %s2710_s7 = sld [smem:[#allocation21_spill]] }
 0x46e   : > { %s2711_s3 = sld [smem:[#allocation22_spill]]  ;;  %s2712_s21 = sld [smem:[#allocation23_spill]] }
 0x46f   : > { %s2713_s30 = smov %s1810_s10  ;;  %s2714_s10 = smov %s1814_s11 }
 0x470   : > { %s2715_s11 = smov %s2203_s19  ;;  %s2716_s13 = smov %s1826_s14 }
 0x471   : > { %s2717_s14 = smov %s2706_s15  ;;  %s2718_s15 = smov %s1834_s16 }
 0x472   : > { %s2719_s16 = smov %s2707_s20  ;;  %31 = sbr.rel (!%p2557_p7) target bundleno = 24 (0x18), region = 141 }
 0x473   : > { %s2720_s19 = smov %s2710_s7 }
 0x474   : > { %s2721_s20 = smov %s2711_s3 }
 0x479   :  { %1175 = vsyncpa [#allocation3], 1 }
 0x47a   :  { %1177 = vsyncpa [#allocation3 + $0x1], 1 }
 0x47b   :  { %1178 = vsyncpa [#allocation6], 1 }
 0x47c   :  { %1180 = vsyncpa [#allocation6 + $0x1], 1 }
 0x47d   :  { %1181 = vsyncpa [#allocation4], 1 }
 0x47e   :  { %1183 = vsyncpa [#allocation4 + $0x1], 1 }
 0x47f   :  { %1184 = vsyncpa [#allocation10], 1 }
 0x480   :  { %1186 = vsyncpa [#allocation10 + $0x1], 1 }

</bundles_post_ra>
